<compile_context>
chip_gen: v6e
topology: v6e:2x2x1
jax: 0.10.0
libtpu: 0.0.40
codegen_flags: <defaults>
</compile_context>

<pallas_src>
import math

import jax
import jax.numpy as jnp
from jax.experimental import pallas as pl
from jax.experimental.pallas import tpu as pltpu

M = 4                      # angular margin (module default)
_PI_REF = 3.14159265       # the module hard-codes this constant (not math.pi)
# Bin thresholds: k = floor(M * acos(c) / _PI_REF) >= j  <=>  c < cos(j * _PI_REF / M)
_B1 = math.cos(1.0 * _PI_REF / M)
_B2 = math.cos(2.0 * _PI_REF / M)
_B3 = math.cos(3.0 * _PI_REF / M)


def _mface_kernel(x_ref, w_ref, xlen_ref, cos_ref, phi_ref):
    # MXU matmul on pre-normalized / pre-renormed (bf16) tiles with f32 accumulation.
    # x rows are unit-norm and w columns are unit-norm -> the product IS cos(theta).
    cos_theta = jnp.clip(
        jnp.dot(x_ref[...], w_ref[...], preferred_element_type=jnp.float32),
        -1.0, 1.0)

    # cos(4*theta) = 8 c^4 - 8 c^2 + 1
    c2 = cos_theta * cos_theta
    cos_m_theta = 8.0 * c2 * c2 - 8.0 * c2 + 1.0

    # k = floor(4*acos(c)/pi) via 3 compares; (-1)^k via xor.  No arccos/floor/mod.
    k1 = cos_theta < _B1
    k2 = cos_theta < _B2
    k3 = cos_theta < _B3
    k = k1.astype(jnp.float32) + k2.astype(jnp.float32) + k3.astype(jnp.float32)
    k_odd = jnp.logical_xor(jnp.logical_xor(k1, k2), k3)
    phi_theta = jnp.where(k_odd, -cos_m_theta, cos_m_theta) - 2.0 * k

    x_len = xlen_ref[...]             # (TB, 1)  ||x_i||  (f32)
    cos_ref[...] = (cos_theta * x_len).astype(cos_ref.dtype)
    phi_ref[...] = (phi_theta * x_len).astype(phi_ref.dtype)


def _round_up(n, m):
    return (n + m - 1) // m * m


def _vmem_bytes(tb, tc, d, mm_bytes, out_bytes):
    # Double-buffered VMEM footprint of one grid step.
    per_step = (tb * d * mm_bytes        # x tile
                + d * tc * mm_bytes      # w tile
                + tb * 4                 # x_len tile (f32)
                + 2 * tb * tc * out_bytes)  # two output tiles
    return 2 * per_step


def mface_linear(x, w, *, block_b=256, block_c=1024, use_bf16_matmul=True,
                 out_dtype=jnp.float32, vmem_budget_bytes=24 << 20):
    """MFaceLinear forward.  x: [B, d], w: [d, C] -> (cos_theta [B, C], phi_theta [B, C])."""
    B, d = x.shape
    d2, C = w.shape
    assert d == d2

    xf = x.astype(jnp.float32)
    wf = w.astype(jnp.float32)

    # ---- hoisted O(B*d + d*C) work, fused by XLA into the pad/cast pass ----
    # w.renorm(2, dim=1, 1e-5).mul(1e5)  ==  w * cscale   (folded into w pre-cast)
    col_norm = jnp.sqrt(jnp.sum(wf * wf, axis=0, keepdims=True))            # [1, C]
    cscale = jnp.where(col_norm > 1e-5, 1e-5 / col_norm, 1.0) * 1e5          # [1, C]
    x_sq = jnp.sum(xf * xf, axis=1, keepdims=True)                           # [B, 1]
    x_inv = jax.lax.rsqrt(x_sq)                                              # 1/||x||  (EUP)
    x_len = jnp.sqrt(x_sq)                                                   # ||x||

    mm_dtype = jnp.bfloat16 if use_bf16_matmul else jnp.float32
    mm_bytes = 2 if use_bf16_matmul else 4
    out_bytes = jnp.dtype(out_dtype).itemsize

    # ---- sublane/lane-aligned tiles, capped by problem size and VMEM budget ----
    tb = min(block_b, _round_up(B, 8))
    tc = min(block_c, _round_up(C, 128))
    while _vmem_bytes(tb, tc, d, mm_bytes, out_bytes) > vmem_budget_bytes and tc > 128:
        tc = max(128, _round_up(tc // 2, 128))
    while _vmem_bytes(tb, tc, d, mm_bytes, out_bytes) > vmem_budget_bytes and tb > 8:
        tb = max(8, _round_up(tb // 2, 8))
    Bp, Cp = _round_up(B, tb), _round_up(C, tc)

    # Fold 1/||x|| into x and cscale into w before the (existing) cast — no extra HBM pass.
    x_in = jnp.pad(xf * x_inv, ((0, Bp - B), (0, 0))).astype(mm_dtype)
    w_in = jnp.pad(wf * cscale, ((0, 0), (0, Cp - C))).astype(mm_dtype)
    x_len_p = jnp.pad(x_len, ((0, Bp - B), (0, 0)))

    grid = (Bp // tb, Cp // tc)
    cost = pl.CostEstimate(
        flops=2 * B * C * d,
        transcendentals=0,
        bytes_accessed=((Cp // tc) * Bp * d * mm_bytes      # x re-read per C step
                        + (Bp // tb) * d * Cp * mm_bytes    # w re-read per B step
                        + (Cp // tc) * Bp * 4                # x_len
                        + 2 * Bp * Cp * out_bytes))          # two outputs
    vmem_limit = min(_vmem_bytes(tb, tc, d, mm_bytes, out_bytes) + (2 << 20), 64 << 20)

    cos_t, phi_t = pl.pallas_call(
        _mface_kernel,
        out_shape=(
            jax.ShapeDtypeStruct((Bp, Cp), out_dtype),
            jax.ShapeDtypeStruct((Bp, Cp), out_dtype),
        ),
        grid=grid,
        in_specs=[
            pl.BlockSpec((tb, d), lambda i, j: (i, 0)),      # pre-normalized x tile
            pl.BlockSpec((d, tc), lambda i, j: (0, j)),      # pre-renormed w tile
            pl.BlockSpec((tb, 1), lambda i, j: (i, 0)),      # ||x||
        ],
        out_specs=(
            pl.BlockSpec((tb, tc), lambda i, j: (i, j)),
            pl.BlockSpec((tb, tc), lambda i, j: (i, j)),
        ),
        compiler_params=pltpu.CompilerParams(
            dimension_semantics=("parallel", "parallel"),
            vmem_limit_bytes=int(vmem_limit),
        ),
        cost_estimate=cost,
    )(x_in, w_in, x_len_p)

    return cos_t[:B, :C], phi_t[:B, :C]


def _reference(x, w, use_bf16_matmul=True):
    """Pure-JAX mirror of the PyTorch forward (arccos/floor path), matched matmul precision."""
    x = x.astype(jnp.float32)
    w = w.astype(jnp.float32)
    col_norm = jnp.sqrt(jnp.sum(w * w, axis=0, keepdims=True))
    cscale = jnp.where(col_norm > 1e-5, 1e-5 / col_norm, 1.0) * 1e5
    x_len = jnp.sqrt(jnp.sum(x * x, axis=1, keepdims=True))
    if use_bf16_matmul:
        # Match the kernel's operand folding + bf16 rounding exactly.
        xn = (x / x_len).astype(jnp.bfloat16)
        wn = (w * cscale).astype(jnp.bfloat16)
        cos_theta = jnp.dot(xn, wn, preferred_element_type=jnp.float32)
    else:
        cos_theta = jnp.dot(x, w * cscale, preferred_element_type=jnp.float32) / x_len
    cos_theta = jnp.clip(cos_theta, -1.0, 1.0)
    cos_m = 8.0 * cos_theta ** 4 - 8.0 * cos_theta ** 2 + 1.0
    theta = jnp.arccos(cos_theta)
    k = jnp.floor(M * theta / _PI_REF)
    phi = (1.0 - 2.0 * jnp.mod(k, 2.0)) * cos_m - 2.0 * k
    return cos_theta * x_len, phi * x_len


if __name__ == "__main__":
    key = jax.random.PRNGKey(0)
    kx, kw = jax.random.split(key)

    # Small demo shapes: 13 face features of dim 64 against 200 identities.
    # Deliberately not tile-aligned (exercises the pad/slice path); tiles forced small so
    # the (B, C) grid has several steps.
    B, d, C = 13, 64, 200

    x = jax.random.normal(kx, (B, d), dtype=jnp.float32)

    # Parameter init mimicking __init__: uniform(-1, 1) then renorm_(2, 1, 1e-5).mul_(1e5).
    w0 = jax.random.uniform(kw, (d, C), dtype=jnp.float32, minval=-1.0, maxval=1.0)
    init_norm = jnp.sqrt(jnp.sum(w0 * w0, axis=0, keepdims=True))
    w = w0 * jnp.where(init_norm > 1e-5, 1e-5 / init_norm, 1.0) * 1e5

    cos_t, phi_t = mface_linear(x, w, block_b=8, block_c=128)
    jax.block_until_ready((cos_t, phi_t))

    # Tight check against a precision-matched (bf16-matmul, same folding) reference.
    ref_cos, ref_phi = _reference(x, w, use_bf16_matmul=True)
    assert jnp.allclose(cos_t, ref_cos, atol=2e-3, rtol=2e-3), "cos_theta mismatch"
    assert jnp.allclose(phi_t, ref_phi, atol=2e-3, rtol=2e-3), "phi_theta mismatch"

    # Loose sanity check against the full-f32 reference (gap bounded by bf16 operand rounding).
    f32_cos, f32_phi = _reference(x, w, use_bf16_matmul=False)
    assert jnp.allclose(cos_t, f32_cos, atol=1.0, rtol=1e-1), "cos_theta far from f32 ref"
    assert jnp.allclose(phi_t, f32_phi, atol=1.0, rtol=1e-1), "phi_theta far from f32 ref"

    print("KERNEL_OK")
</pallas_src>

<mosaic_0001>
module attributes {stable_mosaic.version = 11 : i64} {
  func.func @_mface_kernel(%arg0: i32, %arg1: i32, %arg2: memref<8x64xbf16, #tpu.memory_space<vmem>>, %arg3: memref<64x128xbf16, #tpu.memory_space<vmem>>, %arg4: memref<8x1xf32, #tpu.memory_space<vmem>>, %arg5: memref<8x128xf32, #tpu.memory_space<vmem>>, %arg6: memref<8x128xf32, #tpu.memory_space<vmem>>) attributes {dimension_semantics = [#tpu.dimension_semantics<parallel>, #tpu.dimension_semantics<parallel>], iteration_bounds = array<i64: 2, 2>, scalar_prefetch = 0 : i64, scratch_operands = 0 : i64, tpu.core_type = #tpu.core_type<tc>, window_params = [{transform_indices = @transform_0, window_bounds = array<i64: 8, 64>}, {transform_indices = @transform_1, window_bounds = array<i64: 64, 128>}, {transform_indices = @transform_2, window_bounds = array<i64: 8, 1>}, {transform_indices = @transform_3, window_bounds = array<i64: 8, 128>}, {transform_indices = @transform_4, window_bounds = array<i64: 8, 128>}]} {
    %c0 = arith.constant 0 : index
    %c0_0 = arith.constant 0 : index
    %0 = vector.load %arg2[%c0, %c0_0] : memref<8x64xbf16, #tpu.memory_space<vmem>>, vector<8x64xbf16>
    %c0_1 = arith.constant 0 : index
    %c0_2 = arith.constant 0 : index
    %1 = vector.load %arg3[%c0_1, %c0_2] : memref<64x128xbf16, #tpu.memory_space<vmem>>, vector<64x128xbf16>
    %cst = arith.constant dense<0.000000e+00> : vector<8x128xf32>
    %2 = tpu.matmul %0, %1, %cst {dimension_numbers = #tpu.dot_dimension_numbers<[1], [0], [0], [1], [0, 0, 1, 1], [], []>} : vector<8x64xbf16>, vector<64x128xbf16>, vector<8x128xf32> -> vector<8x128xf32>
    %cst_3 = arith.constant -1.000000e+00 : f32
    %cst_4 = arith.constant 1.000000e+00 : f32
    %3 = vector.broadcast %cst_3 : f32 to vector<8x128xf32>
    %4 = arith.maximumf %3, %2 : vector<8x128xf32>
    %5 = vector.broadcast %cst_4 : f32 to vector<8x128xf32>
    %6 = arith.minimumf %5, %4 : vector<8x128xf32>
    %7 = arith.mulf %6, %6 : vector<8x128xf32>
    %cst_5 = arith.constant 8.000000e+00 : f32
    %8 = vector.broadcast %cst_5 : f32 to vector<8x128xf32>
    %9 = arith.mulf %8, %7 : vector<8x128xf32>
    %10 = arith.mulf %9, %7 : vector<8x128xf32>
    %cst_6 = arith.constant 8.000000e+00 : f32
    %11 = vector.broadcast %cst_6 : f32 to vector<8x128xf32>
    %12 = arith.mulf %11, %7 : vector<8x128xf32>
    %13 = arith.subf %10, %12 : vector<8x128xf32>
    %cst_7 = arith.constant 1.000000e+00 : f32
    %14 = vector.broadcast %cst_7 : f32 to vector<8x128xf32>
    %15 = arith.addf %13, %14 : vector<8x128xf32>
    %cst_8 = arith.constant 0.707106769 : f32
    %16 = vector.broadcast %cst_8 : f32 to vector<8x128xf32>
    %17 = arith.cmpf olt, %6, %16 : vector<8x128xf32>
    %cst_9 = arith.constant 1.79489656E-9 : f32
    %18 = vector.broadcast %cst_9 : f32 to vector<8x128xf32>
    %19 = arith.cmpf olt, %6, %18 : vector<8x128xf32>
    %cst_10 = arith.constant -0.707106769 : f32
    %20 = vector.broadcast %cst_10 : f32 to vector<8x128xf32>
    %21 = arith.cmpf olt, %6, %20 : vector<8x128xf32>
    %22 = arith.extui %17 : vector<8x128xi1> to vector<8x128xi32>
    %23 = arith.sitofp %22 : vector<8x128xi32> to vector<8x128xf32>
    %24 = arith.extui %19 : vector<8x128xi1> to vector<8x128xi32>
    %25 = arith.sitofp %24 : vector<8x128xi32> to vector<8x128xf32>
    %26 = arith.addf %23, %25 : vector<8x128xf32>
    %27 = arith.extui %21 : vector<8x128xi1> to vector<8x128xi32>
    %28 = arith.sitofp %27 : vector<8x128xi32> to vector<8x128xf32>
    %29 = arith.addf %26, %28 : vector<8x128xf32>
    %30 = arith.xori %17, %19 : vector<8x128xi1>
    %31 = arith.xori %30, %21 : vector<8x128xi1>
    %cst_11 = arith.constant 0.000000e+00 : f32
    %32 = vector.broadcast %cst_11 : f32 to vector<8x128xf32>
    %33 = arith.subf %32, %15 : vector<8x128xf32>
    %34 = arith.select %31, %33, %15 : vector<8x128xi1>, vector<8x128xf32>
    %cst_12 = arith.constant 2.000000e+00 : f32
    %35 = vector.broadcast %cst_12 : f32 to vector<8x128xf32>
    %36 = arith.mulf %35, %29 : vector<8x128xf32>
    %37 = arith.subf %34, %36 : vector<8x128xf32>
    %c0_13 = arith.constant 0 : index
    %c0_14 = arith.constant 0 : index
    %38 = vector.load %arg4[%c0_13, %c0_14] : memref<8x1xf32, #tpu.memory_space<vmem>>, vector<8x1xf32>
    %39 = vector.broadcast %38 : vector<8x1xf32> to vector<8x128xf32>
    %40 = arith.mulf %6, %39 : vector<8x128xf32>
    %c0_15 = arith.constant 0 : index
    %c0_16 = arith.constant 0 : index
    %41 = vector.load %arg5[%c0_15, %c0_16] : memref<8x128xf32, #tpu.memory_space<vmem>>, vector<8x128xf32>
    tpu.vector_store %arg5[%c0_15, %c0_16], %40 {strides = array<i32>} : memref<8x128xf32, #tpu.memory_space<vmem>>, vector<8x128xf32>,
    %42 = vector.broadcast %38 : vector<8x1xf32> to vector<8x128xf32>
    %43 = arith.mulf %37, %42 : vector<8x128xf32>
    %c0_17 = arith.constant 0 : index
    %c0_18 = arith.constant 0 : index
    %44 = vector.load %arg6[%c0_17, %c0_18] : memref<8x128xf32, #tpu.memory_space<vmem>>, vector<8x128xf32>
    tpu.vector_store %arg6[%c0_17, %c0_18], %43 {strides = array<i32>} : memref<8x128xf32, #tpu.memory_space<vmem>>, vector<8x128xf32>,
    return
  }
  func.func @transform_0(%arg0: i32, %arg1: i32) -> (i32, i32) {
    %c0_i32 = arith.constant 0 : i32
    %c0_i32_0 = arith.constant 0 : i32
    return %arg0, %c0_i32 : i32, i32
  }
  func.func @transform_1(%arg0: i32, %arg1: i32) -> (i32, i32) {
    %c0_i32 = arith.constant 0 : i32
    %c0_i32_0 = arith.constant 0 : i32
    return %c0_i32, %arg1 : i32, i32
  }
  func.func @transform_2(%arg0: i32, %arg1: i32) -> (i32, i32) {
    %c0_i32 = arith.constant 0 : i32
    %c0_i32_0 = arith.constant 0 : i32
    return %arg0, %c0_i32 : i32, i32
  }
  func.func @transform_3(%arg0: i32, %arg1: i32) -> (i32, i32) {
    %c0_i32 = arith.constant 0 : i32
    return %arg0, %arg1 : i32, i32
  }
  func.func @transform_4(%arg0: i32, %arg1: i32) -> (i32, i32) {
    %c0_i32 = arith.constant 0 : i32
    return %arg0, %arg1 : i32, i32
  }
}

</mosaic_0001>

<bundles_post_ra>
// kernel: tpu_custom_call.1
= control target key start
LH: loop header
LB: loop body
LE: loop exit
PB: predicated region body
PF: predicated region fallthrough
CT: control target
= control target key end

     0   :  { %10 = vsyncpa [#allocation3], 0  ;;  %s1184_s0 = inlined_call_operand.vmem [shape: bf16[16,64], index: 0, kind: input, shape index: {}]   ;;  %s1185_s1 = inlined_call_operand.hbm [shape: bf16[64,256], index: 1, kind: input, shape index: {}]   ;;  %s1186_s2 = inlined_call_operand.vmem [shape: f32[16,1], index: 2, kind: input, shape index: {}]   ;;  %s1187_s3 = inlined_call_operand.hbm [shape: f32[16,256], index: 3, kind: output, shape index: {0}]   ;;  %s1188_s4 = inlined_call_operand.hbm [shape: f32[16,256], index: 4, kind: output, shape index: {1}]  }
   0x1   :  { %12 = vsyncpa [#allocation3 + $0x1], 0 }
   0x2   :  { %13 = vsyncpa [#allocation4], 0 }
   0x3   :  { %15 = vsyncpa [#allocation4 + $0x1], 0 }
   0x4   :  { %16 = vsyncpa [#allocation7], 0 }
   0x5   :  { %18 = vsyncpa [#allocation7 + $0x1], 0  ;;  %s943_s15 = smov 0   ;;  %s945_s16 = smov 0  }
   0x6   :  { %s947_s17 = smov 0   ;;  %s949_s18 = smov 0  }
   0x7   :  { %s951_s19 = smov 0   ;;  %s953_s20 = smov 0  }
   0x8   :  { %s955_s21 = smov 0   ;;  %s957_s22 = smov 0  }
   0x9   :  { %s959_s23 = smov 0   ;;  %s961_s24 = smov 0  }
   0xa   :  { %s963_s25 = smov 0  }
   0xb LB: > { %1193 = sst [smem:[#allocation11_spill]] %s899_s23  ;;  %s565_s26 = sadd.s32 4294967295, %s907_s25   ;;  %s907_s25 = sphi %s963_s25, %s24_s25   ;;  %s903_s24 = sphi %s961_s24, %s1207_s24   ;;  %s899_s23 = sphi %s959_s23, %s1206_s23   ;;  %s895_s22 = sphi %s957_s22, %s1205_s22   ;;  %s891_s21 = sphi %s955_s21, %s1204_s21   ;;  %s887_s20 = sphi %s953_s20, %s1213_s20   ;;  %s883_s19 = sphi %s951_s19, %s1212_s19   ;;  %s879_s18 = sphi %s949_s18, %s1211_s18   ;;  %s875_s17 = sphi %s947_s17, %s1210_s17   ;;  %s871_s16 = sphi %s945_s16, %s1209_s16   ;;  %s867_s15 = sphi %s943_s15, %s1208_s15  }
   0xc   : > { %1194 = sst [smem:[#allocation12_spill]] %s903_s24  ;;  %s566_s27 = sadd.s32 4294967294, %s907_s25  }
   0xd   : > { %s33_s28 = sadd.s32 1, %s899_s23  ;;  %s36_s29 = sadd.s32 1, %s903_s24 }
   0xe   : > { %p34_p0 = scmp.ge.s32.totalorder %s33_s28, 2  ;;  %s69_s30 = sadd.s32 1, %s887_s20 }
   0xf   : > { %p76_p1 = scmp.ne.s32.totalorder %s887_s20, %s883_s19  ;;  %p77_p2 = scmp.eq.s32.totalorder %s907_s25, 0 }
  0x10   : > { %s1215_s28 = smov (%p34_p0, %s33_s28), 0  ;;  %s1217_s29 = smov (!%p34_p0, %s36_s29), %s903_s24 }
  0x11   : > { %1195 = sst [smem:[#allocation13_spill]] %s1215_s28  ;;  %s66_s5 = ssub.s32 %s899_s23, %s1215_s28 }
  0x12   : > { %p1009_p3 = por %p77_p2, %p76_p1  ;;  %p38_p4 = scmp.ge.s32.totalorder %s1217_s29, 2 }
  0x13   : > { %p67_p5 = scmp.eq.s32.totalorder %s66_s5, 0  ;;  %p82_p6 = scmp.ne.s32.totalorder %s883_s19, %s879_s18 }
  0x14   : > { %p83_p7 = scmp.eq.s32.totalorder %s565_s26, 0  ;;  %s1219_s29 = smov (%p38_p4, %s1217_s29), 0 }
  0x15   : > { %1197 = sst [smem:[#allocation14_spill]] %s1219_s29  ;;  %s118_s9 = ssub.s32 %s903_s24, %s1219_s29 }
  0x16   : > { %s1017_s7 = scalar_select %p67_p5, %s887_s20, %s69_s30  }
  0x17   : > { %p1019_p8 = por %p83_p7, %p82_p6  ;;  %s120_s10 = sor.u32 %s118_s9, %s66_s5 }
  0x18   : > { %1198 = sst [smem:[#allocation15_spill]] %s1017_s7  ;;  %s123_s11 = sadd.s32 1, %s875_s17 }
  0x19   : > { %p121_p9 = scmp.eq.s32.totalorder %s120_s10, 0  ;;  %p133_p10 = scmp.ne.s32.totalorder %s875_s17, %s871_s16 }
  0x1a   : > { %p134_p11 = scmp.eq.s32.totalorder %s565_s26, 3  ;;  %p139_p12 = scmp.ne.s32.totalorder %s871_s16, %s867_s15 }
  0x1b   : > { %s1031_s12 = scalar_select %p121_p9, %s875_s17, %s123_s11  }
  0x1c   : > { %p1033_p13 = por %p134_p11, %p133_p10  ;;  %p140_p0 = scmp.eq.s32.totalorder %s566_s27, 3 }
  0x1d   : > { %p628_p1 = scmp.lt.s32.totalorder %s907_s25, 4  ;;  %s195_s18 = sand.u32 1, %s887_s20  }
  0x1e   : > { %p1038_p2 = por %p140_p0, %p139_p12  ;;  %s569_s30 = sshll.u32 %s195_s18, 5 }
  0x1f   : > { %s570_s5 = sshll.u32 %s899_s23, 6  ;;  %s199_s29 = scalar_lea.vmem [#allocation2], %s569_s30 }
  0x20   : > { %s204_s26 = scalar_lea.hbm %s1185_s1, %s570_s5  ;;  %s205_s11 = sshll.u32 %s199_s29, 4  ;;  %s206_s11 = int_to_ptr.vmem [resolvable:$true] %s205_s11 }
  0x21   : > { %p1049_p4 = pnand %p628_p1, %p1009_p3  ;;  %s196_s27 = scalar_lea.sflag [#allocation3], %s195_s18 }
  0x22   : > { %s742_s24 = scalar_lea.vmem %s206_s11, 512  ;;  %s909_s23 = smov [#allocation2]  }
  0x23   : > { %p731_p5 = pneg %p1049_p4  ;;  %p743_p6 = scmp.ne.s32.totalorder %s206_s11, %s742_s24 }
  0x24   : > { %s747_s7 = sshll.u32 %s909_s23, 4  ;;  %s748_s7 = int_to_ptr.vmem [resolvable:$false] %s747_s7 }
  0x25   : > { %p745_p7 = pnand %p743_p6, %p731_p5  ;;  %s749_s5 = scalar_lea.vmem %s748_s7, 1024 }
  0x26   : > { %p750_p10 = scmp.lt.s32.totalorder %s206_s11, %s748_s7  ;;  %p751_p11 = scmp.lt.s32.totalorder %s749_s5, %s742_s24 }
  0x27   : > { %p746_p9 = pneg %p745_p7 }
  0x28   : > { %p752_p12 = por %p751_p11, %p750_p10 }
  0x2a   : > { %p753_p0 = pnand %p752_p12, %p746_p9 }
  0x2c   : > { %756 = shalt.err (!%p753_p0)
}
  0x2d   : > { %s910_s29 = smov 128   ;;  %s911_s6 = smov 64  }
  0x2e   : > { %s912_s18 = smov 4   ;;  %p571_p3 = scmp.ge.s32.totalorder %s907_s25, 1 }
  0x2f   : > { %620 = dma.hbm_to_vmem [thread:$0]  (!%p1049_p4), %s204_s26, 512, %s206_s11, %s196_s27, %s910_s29, %s911_s6, %s912_s18  }
  0x30   : > { %p220_p1 = scmp.lt.s32.totalorder %s907_s25, 5 }
  0x32   : > { %p221_p5 = pnand %p571_p3, %p220_p1 }
  0x33   : > { %s226_s23 = sand.u32 (!%p221_p5), 1, %s883_s19  }
  0x34   : > { %224 = sbr.rel (%p221_p5) target bundleno = 310 (0x136), region = 32  ;;  %s572_s7 = sshll.u32 (!%p221_p5), %s226_s23, 5 }
  0x35   : > { %s227_s24 = scalar_lea.sflag (!%p221_p5), [#allocation3], %s226_s23  ;;  %s230_s30 = scalar_lea.vmem (!%p221_p5), [#allocation2], %s572_s7 }
  0x39   : > { %854 = dma.done.wait (%p1019_p8), %s227_s24, 512  }
  0x3a   : > { %856 = vsyncadd (%p1019_p8), %s227_s24, 4294966784  ;;  %p268_p6 = scmp.lt.s32.totalorder %s895_s22, 1  ;;  %v913_v0 = vmov 0.0   ;;  %vm914_vm0 = vmmov 0   ;;  %v915_v1 = vmov 0   ;;  %v725_v2 = vld [vmem:[%s230_s30 + $0x18] sm:$0xff]  }
  0x3b   : > { %599 = vmatprep.subr.bf16.mxu0 %v913_v0  ;;  %607 = vmatprep.mubr.msk.bf16.mxu0 %vm914_vm0, %v913_v0  ;;  %v726_v3 = vld [vmem:[%s230_s30 + $0x10] sm:$0xff]   ;;  %v727_v5 = vld [vmem:[%s230_s30 + $0x8] sm:$0xff]   ;;  %v728_v6 = vld [vmem:[%s230_s30] sm:$0xff]   ;;  %vm310_vm1 = vcmask 523264   ;;  %s1078_s6 = sand.u32 1, %s871_s16   ;;  %s588_s18 = sshll.u32 %s895_s22, 1 }
  0x3c   : > { %724 = vset.pattern.permute.xlu0 %v915_v1  ;;  %s269_s28 = scalar_select %p268_p6, %s895_s22, 1  ;;  %600 = vmatpush3.bf16.msra.mxu0 %v725_v2 }
  0x3d   : > { %601 = vmatprep.subr.bf16.mxu0 %v913_v0  ;;  %s573_s23 = sshll.u32 %s1078_s6, 3  ;;  %s1083_s7 = sadd.s32 %s891_s21, %s588_s18 }
  0x3e   : > { %s576_s9 = sshll.u32 %s269_s28, 3  ;;  %s575_s8 = sshll.u32 %s269_s28, 2 }
  0x3f   : > { %s275_s11 = scalar_lea.vmem %s1186_s2, %s576_s9  ;;  %s271_s29 = scalar_lea.vmem %s1184_s0, %s575_s8 }
  0x40   : > { %v378_v4 = vld [vmem:[%s275_s11] sm:$0xff]  ;;  %602 = vmatpush3.bf16.msra.mxu0 %v726_v3  ;;  %s589_s24 = sshll.u32 %s1083_s7, 7  ;;  %s260_s30 = scalar_lea.vmem [#allocation5], %s573_s23 }
  0x41   : > { %381 = vperm.xlu0 %724, %v378_v4   ;;  %603 = vmatprep.subr.bf16.mxu0 %v913_v0  ;;  %v277_v7 = vld [vmem:[%s271_s29] sm:$0xf]  ;;  %s409_s28 = sshll.u32 %s260_s30, 4  ;;  %s1097_s9 = scalar_lea.hbm %s1187_s3, %s589_s24  ;;  %s1099_s28 = int_to_ptr.vmem [resolvable:$true] %s409_s28 }
  0x42   : > { %s389_s10 = scalar_lea.sflag [#allocation4], %s1078_s6  ;;  %s757_s26 = scalar_lea.vmem %s1099_s28, 128 }
  0x43   : > { %p758_p8 = scmp.ne.s32.totalorder %s1099_s28, %s757_s26  ;;  %s916_s11 = smov [#allocation5]  }
  0x44   : > { %604 = vmatpush3.bf16.msra.mxu0 %v727_v5  ;;  %s761_s8 = sshll.u32 %s916_s11, 4  ;;  %s762_s8 = int_to_ptr.vmem [resolvable:$false] %s761_s8 }
  0x45   : > { %605 = vmatprep.subr.bf16.mxu0 %v913_v0  ;;  %p759_p4 = pnand %p758_p8, %p1033_p13  ;;  %s763_s27 = scalar_lea.vmem %s762_s8, 256 }
  0x46   : > { %p764_p9 = scmp.lt.s32.totalorder %s1099_s28, %s762_s8  ;;  %p765_p10 = scmp.lt.s32.totalorder %s763_s27, %s757_s26 }
  0x47   : > { %p760_p7 = pneg %p759_p4 }
  0x48   : > { %606 = vmatpush3.bf16.msra.mxu0 %v728_v6  ;;  %p766_p11 = por %p765_p10, %p764_p9 }
  0x4a   : > { %p767_p12 = pnand %p766_p11, %p760_p7 }
  0x4b   : > { %608 = vmatmul.mubr.msk.bf16.vlgmr.msra.gmra.mxu0 %vm310_vm1, %v277_v7 }
  0xbc   : > { %v382_v10 = vpop.permute.xlu0 %381 }
 0x10b   : > { %v348_v8 = vpop.f32.mrf.mxu0 }
 0x10c   : > { %v582_v9 = vclamps-f32 %v348_v8, 1.0 }
 0x10d   : > { %v609_v11 = vpop.f32.mrf.mxu0 }
 0x10e   : > { %v356_v12 = vmul.f32 %v582_v9, %v582_v9  ;;  %vm361_vm2 = vcmp.lt.f32.partialorder %v582_v9, 0.70710677  ;;  %vm362_vm3 = vcmp.lt.f32.partialorder %v582_v9, 1.7948966e-09  ;;  %v384_v15 = vmul.f32 %v582_v9, %v382_v10 }
 0x10f   : > { %v583_v13 = vsel %vm361_vm2, 1.0, %v913_v0  ;;  %v584_v14 = vsel %vm362_vm3, 1.0, %v913_v0  ;;  %v351_v16 = vpop.f32.mrf.mxu0  ;;  %vm363_vm4 = vcmp.lt.f32.partialorder %v582_v9, -0.70710677 }
 0x110   : > { %v357_v17 = vmul.f32 8.0, %v356_v12  ;;  %v368_v18 = vadd.f32 %v584_v14, %v583_v13  ;;  %385 = vst [vmem:[%s260_s30] sm:$0xff] %v384_v15 }
 0x111   : > { %v610_v19 = vpop.f32.mrf.mxu0 }
 0x112   : > { %v358_v20 = vmul.f32 %v357_v17, %v356_v12 }
 0x113   : > { %770 = shalt.err (!%p767_p12)
}
 0x114   : > { %s771_s5 = scalar_lea.hbm %s1097_s9, 128  ;;  %s775_s30 = scalar_lea.hbm %s1187_s3, 512 }
 0x115   : > { %p772_p0 = scmp.ne.s32.totalorder %s1097_s9, %s771_s5  ;;  %p776_p5 = scmp.lt.s32.totalorder %s1097_s9, %s1187_s3 }
 0x116   : > { %p777_p6 = scmp.lt.s32.totalorder %s775_s30, %s771_s5 }
 0x117   : > { %p773_p3 = pnand %p772_p0, %p1033_p13 }
 0x118   : > { %p778_p8 = por %p777_p6, %p776_p5 }
 0x119   : > { %p774_p1 = pneg %p773_p3 }
 0x11b   : > { %p779_p4 = pnand %p778_p8, %p774_p1 }
 0x11d   : > { %782 = shalt.err (!%p779_p4)
}
 0x11e   : > { %613 = dma.vmem_to_hbm [thread:$0]  (%p1033_p13), %s1099_s28, 128, %s1097_s9, %s389_s10   ;;  %v359_v21 = vsub.f32 %v358_v20, %v357_v17  ;;  %v585_v22 = vsel %vm363_vm4, 1.0, %v913_v0  ;;  %vm372_vm5 = vmxor %vm361_vm2, %vm362_vm3 }
 0x11f   : > { %v371_v23 = vadd.f32 %v585_v22, %v368_v18  ;;  %vm373_vm6 = vmxor %vm372_vm5, %vm363_vm4  ;;  %s267_s26 = scalar_lea.vmem [#allocation6], %s573_s23  ;;  %s422_s10 = scalar_lea.hbm %s1188_s4, %s589_s24 }
 0x120   : > { %v360_v24 = vadd.f32 1.0, %v359_v21  ;;  %s424_s11 = sshll.u32 %s267_s26, 4  ;;  %s394_s8 = scalar_lea.sflag [#allocation7], %s1078_s6  ;;  %s425_s11 = int_to_ptr.vmem [resolvable:$true] %s424_s11 }
 0x121   : > { %v376_v26 = vmul.f32 2.0, %v371_v23  ;;  %s783_s27 = scalar_lea.vmem %s425_s11, 128  ;;  %s917_s5 = smov [#allocation6]  }
 0x122   : > { %v374_v25 = vsub.f32 0.0, %v360_v24  ;;  %p784_p7 = scmp.ne.s32.totalorder %s425_s11, %s783_s27  ;;  %s787_s29 = sshll.u32 %s917_s5, 4  ;;  %s788_s29 = int_to_ptr.vmem [resolvable:$false] %s787_s29 }
 0x123   : > { %s789_s23 = scalar_lea.vmem %s788_s29, 256  ;;  %p790_p11 = scmp.lt.s32.totalorder %s425_s11, %s788_s29 }
 0x124   : > { %v375_v27 = vsel %vm373_vm6, %v374_v25, %v360_v24  ;;  %p785_p9 = pnand %p784_p7, %p1033_p13  ;;  %p791_p12 = scmp.lt.s32.totalorder %s789_s23, %s783_s27 }
 0x125   : > { %v377_v28 = vsub.f32 %v375_v27, %v376_v26 }
 0x126   : > { %p786_p10 = pneg %p785_p9  ;;  %p792_p0 = por %p791_p12, %p790_p11 }
 0x127   : > { %v386_v29 = vmul.f32 %v382_v10, %v377_v28 }
 0x128   : > { %p793_p3 = pnand %p792_p0, %p786_p10 }
 0x129   : > { %387 = vst [vmem:[%s267_s26] sm:$0xff] %v386_v29 }
 0x12a   : > { %796 = shalt.err (!%p793_p3)
}
 0x12b   : > { %s797_s7 = scalar_lea.hbm %s422_s10, 128  ;;  %s801_s18 = scalar_lea.hbm %s1188_s4, 512 }
 0x12c   : > { %p798_p1 = scmp.ne.s32.totalorder %s422_s10, %s797_s7  ;;  %p802_p8 = scmp.lt.s32.totalorder %s422_s10, %s1188_s4 }
 0x12d   : > { %p803_p4 = scmp.lt.s32.totalorder %s801_s18, %s797_s7 }
 0x12e   : > { %p799_p5 = pnand %p798_p1, %p1033_p13 }
 0x12f   : > { %p804_p7 = por %p803_p4, %p802_p8 }
 0x130   : > { %p800_p6 = pneg %p799_p5 }
 0x132   : > { %p805_p9 = pnand %p804_p7, %p800_p6 }
 0x134   : > { %808 = shalt.err (!%p805_p9)
}
 0x135   : > { %614 = dma.vmem_to_hbm [thread:$0]  (%p1033_p13), %s425_s11, 128, %s422_s10, %s394_s8  }
 0x136 PF: > { %p629_p10 = scmp.ge.s32.totalorder %s907_s25, 2  ;;  %s436_s22 = sand.u32 1, %s867_s15  }
 0x137   : > { %s437_s26 = scalar_lea.sflag [#allocation4], %s436_s22 }
 0x138   : > { %p622_p11 = pnand %p629_p10, %p1038_p2 }
 0x13a   : > { %p623_p12 = pneg %p622_p11 }
 0x13c   : > { %858 = dma.done.wait (%p623_p12), %s437_s26, 128  }
 0x13d   : > { %860 = vsyncadd (%p623_p12), %s437_s26, 4294967168  ;;  %s446_s28 = scalar_lea.sflag [#allocation7], %s436_s22 }
 0x13e   : > { %862 = dma.done.wait (%p623_p12), %s446_s28, 128  }
 0x13f   : > { %864 = vsyncadd (%p623_p12), %s446_s28, 4294967168  ;;  %s24_s25 = sadd.s32 1, %s907_s25   ;;  %s1203_s13 = sld [smem:[#allocation15_spill]] }
 0x140   : > { %p21_p0 = scmp.ge.s32.totalorder %s24_s25, 6   ;;  %s1204_s21 = sld [smem:[#allocation11_spill]] }
 0x141   : > { %s1205_s22 = sld [smem:[#allocation12_spill]]  ;;  %s1208_s15 = smov %s871_s16 }
 0x142   : > { %s1206_s23 = sld [smem:[#allocation13_spill]]  ;;  %s1209_s16 = smov %s875_s17 }
 0x143   : > { %s1207_s24 = sld [smem:[#allocation14_spill]]  ;;  %s1210_s17 = smov %s1031_s12 }
 0x144   : > { %s1211_s18 = smov %s883_s19  ;;  %s1212_s19 = smov %s887_s20 }
 0x145   : > { %s1213_s20 = smov %s1203_s13  ;;  %23 = sbr.rel (!%p21_p0) target bundleno = 11 (0xb), region = 100 }
 0x14a   :  { %451 = vsyncpa [#allocation3], 1 }
 0x14b   :  { %453 = vsyncpa [#allocation3 + $0x1], 1 }
 0x14c   :  { %454 = vsyncpa [#allocation4], 1 }
 0x14d   :  { %456 = vsyncpa [#allocation4 + $0x1], 1 }
 0x14e   :  { %457 = vsyncpa [#allocation7], 1 }
 0x14f   :  { %459 = vsyncpa [#allocation7 + $0x1], 1 }

</bundles_post_ra>
